<compile_context>
chip_gen: v7x
topology: tpu7x:2x2x1
jax: 0.10.0
libtpu: 0.0.40
codegen_flags: <defaults>
</compile_context>

<pallas_src>
import functools
import math

import jax
import jax.numpy as jnp
from jax.experimental import pallas as pl
from jax.experimental.pallas import tpu as pltpu


def _round_up(x, m):
    return ((x + m - 1) // m) * m


def _sublane_align(dtype):
    # 8 rows for 4-byte dtypes, 16 for 2-byte, 32 for 1-byte.
    return max(8, 32 // jnp.dtype(dtype).itemsize)


def _qfl_kernel(inv_pn_ref, x_ref, t_ref, o_ref, *, beta):
    # x_ref / t_ref / o_ref: (tile_rows, C) VMEM tiles; inv_pn_ref: (1,) SMEM.
    x = x_ref[...].astype(jnp.float32)
    t = t_ref[...].astype(jnp.float32)

    # One exp per element shared between sigmoid and the BCE log term.
    e = jnp.exp(-jnp.abs(x))                      # EUP
    denom = 1.0 + e
    r = pl.reciprocal(denom, approx=True)         # EUP (approx)
    r = r * (2.0 - denom * r)                     # one Newton step -> ~f32 accuracy
    pred_sigmoid = jnp.where(x >= 0.0, r, e * r)

    scale_factor = pred_sigmoid - t

    # Numerically-stable binary_cross_entropy_with_logits (reduction='none'):
    #   max(x, 0) - x * t + log(1 + exp(-|x|))     (reuses denom = 1 + e)
    bce = jnp.maximum(x, 0.0) - x * t + jnp.log(denom)

    if beta == 2.0:
        # |sf|^2 == sf*sf; abs is redundant when squaring.
        mod = scale_factor * scale_factor
    elif float(beta).is_integer() and 1 <= int(beta) <= 4:
        a = jnp.abs(scale_factor)
        mod = a
        for _ in range(int(beta) - 1):
            mod = mod * a
    else:
        # General (non-integer) beta: fall back to pow (exp+log on the EUP).
        mod = jnp.power(jnp.abs(scale_factor), jnp.float32(beta))

    inv_pn = inv_pn_ref[0]  # already 1 / clamp(pos_normalizer, 1.0)
    o_ref[...] = (bce * mod * inv_pn).astype(o_ref.dtype)


def quality_focal_loss_no_reduction(inputs, targets, pos_normalizer=None, beta=2.0):
    """inputs: logits [B, M, C]; targets: sigmoid-space [B, M, C]; returns [B, M, C]."""
    if pos_normalizer is None:
        pos_normalizer = 1.0
    # TODO(synk): pos_normalizer is assumed scalar (matches the module's default
    # torch.tensor(1.0)); a broadcastable tensor normalizer is not supported here.
    pn = jnp.asarray(pos_normalizer, dtype=jnp.float32)
    inv_pn = (1.0 / jnp.maximum(pn, 1.0)).reshape((1,))  # hoisted out of the kernel

    orig_shape = inputs.shape
    out_dtype = inputs.dtype

    # Native-layout 2D view: merge leading dims (free), keep the class axis as lanes.
    if inputs.ndim >= 2:
        C = orig_shape[-1]
        R = math.prod(orig_shape[:-1])
    elif inputs.ndim == 1:
        C = orig_shape[0]
        R = 1
    else:
        C = 1
        R = 1
    x2 = inputs.reshape(R, C)
    t2 = targets.reshape(R, C)

    in_b = jnp.dtype(inputs.dtype).itemsize
    out_b = jnp.dtype(out_dtype).itemsize
    align = max(_sublane_align(inputs.dtype), _sublane_align(out_dtype))

    # Per-generation VMEM budgeting (v7x: 64 MiB physical per TC; v5e/v6e: 128 MiB).
    vmem_cap = 64 << 20  # conservative default if the query is unavailable
    try:
        vmem_cap = int(getattr(pltpu.get_tpu_info(), "vmem_capacity_bytes", vmem_cap))
    except Exception:
        pass
    if vmem_cap >= (96 << 20):        # v5e / v6e: plenty of VMEM, bigger tiles
        buf_budget = 48 << 20         # 3 streams x 2 buffers total
        vmem_limit = 64 << 20
    else:                             # v7x (or unknown): stay well inside 64 MiB
        buf_budget = 24 << 20
        vmem_limit = 32 << 20

    lane_pad = _round_up(C, 128)                       # VMEM tiles pad lanes to 128
    bytes_per_row = lane_pad * (2 * in_b + out_b)      # 2 inputs + 1 output
    tile_rows = max(align, (buf_budget // (2 * bytes_per_row)) // align * align)

    if R <= align:
        tile_rows = R                                  # single full-extent block
    else:
        tile_rows = min(tile_rows, _round_up(R, align))
        # Keep >= 2 grid steps when possible so the 'parallel' axis feeds both
        # TensorCores on v7x (near-free extra step on single-TC chips).
        tile_rows = min(tile_rows, _round_up(pl.cdiv(R, 2), align))

    grid = (pl.cdiv(R, tile_rows),)
    vmem_limit = max(vmem_limit, 2 * tile_rows * bytes_per_row + (8 << 20))

    kernel = functools.partial(_qfl_kernel, beta=float(beta))

    out2 = pl.pallas_call(
        kernel,
        out_shape=jax.ShapeDtypeStruct((R, C), out_dtype),
        grid=grid,
        in_specs=[
            pl.BlockSpec(memory_space=pltpu.MemorySpace.SMEM),   # inv_pn scalar
            pl.BlockSpec((tile_rows, C), lambda i: (i, 0)),      # logits tile
            pl.BlockSpec((tile_rows, C), lambda i: (i, 0)),      # target tile
        ],
        out_specs=pl.BlockSpec((tile_rows, C), lambda i: (i, 0)),
        compiler_params=pltpu.CompilerParams(
            dimension_semantics=("parallel",),      # shard row-tiles across TCs on v7x
            vmem_limit_bytes=int(vmem_limit),
        ),
    )(inv_pn, x2, t2)

    return out2.reshape(orig_shape)


def _reference(inputs, targets, pos_normalizer, beta=2.0):
    """Pure-JAX reference of the PyTorch forward."""
    x = inputs.astype(jnp.float32)
    t = targets.astype(jnp.float32)
    pred = jax.nn.sigmoid(x)
    sf = pred - t
    bce = jnp.maximum(x, 0.0) - x * t + jnp.log1p(jnp.exp(-jnp.abs(x)))
    loss = bce * jnp.power(jnp.abs(sf), beta)
    loss = loss / jnp.maximum(jnp.asarray(pos_normalizer, jnp.float32), 1.0)
    return loss.astype(inputs.dtype)


if __name__ == "__main__":
    key = jax.random.PRNGKey(0)
    k1, k2, k3, k4 = jax.random.split(key, 4)

    # Small shape consistent with the module's [B, M, C] forward.
    B, M, C = 2, 16, 8
    inputs = jax.random.normal(k1, (B, M, C), dtype=jnp.float32) * 3.0   # logits
    targets = jax.random.uniform(k2, (B, M, C), dtype=jnp.float32)       # sigmoid-space
    pos_normalizer = jnp.float32(0.5)  # clamps to 1.0, like torch.clamp(min=1.0)

    out = quality_focal_loss_no_reduction(inputs, targets, pos_normalizer, beta=2.0)
    out = jax.block_until_ready(out)
    ref = _reference(inputs, targets, pos_normalizer, beta=2.0)
    assert out.shape == (B, M, C)
    assert jnp.allclose(out, ref, atol=1e-4, rtol=1e-4), "mismatch vs reference (small)"

    # Second check: C not a multiple of 128 and row count that splits across tiles.
    B2, M2, C2 = 2, 128, 80
    inputs2 = jax.random.normal(k3, (B2, M2, C2), dtype=jnp.float32) * 3.0
    targets2 = jax.random.uniform(k4, (B2, M2, C2), dtype=jnp.float32)
    pn2 = jnp.float32(7.0)

    out2 = quality_focal_loss_no_reduction(inputs2, targets2, pn2, beta=2.0)
    out2 = jax.block_until_ready(out2)
    ref2 = _reference(inputs2, targets2, pn2, beta=2.0)
    assert out2.shape == (B2, M2, C2)
    assert jnp.allclose(out2, ref2, atol=1e-4, rtol=1e-4), "mismatch vs reference (large)"

    print("KERNEL_OK")
</pallas_src>

<mosaic_0001>
module attributes {stable_mosaic.version = 11 : i64} {
  func.func @_qfl_kernel(%arg0: i32, %arg1: memref<1xf32, #tpu.memory_space<smem>>, %arg2: memref<16x8xf32, #tpu.memory_space<vmem>>, %arg3: memref<16x8xf32, #tpu.memory_space<vmem>>, %arg4: memref<16x8xf32, #tpu.memory_space<vmem>>) attributes {dimension_semantics = [#tpu.dimension_semantics<parallel>], iteration_bounds = array<i64: 2>, scalar_prefetch = 0 : i64, scratch_operands = 0 : i64, tpu.core_type = #tpu.core_type<tc>, window_params = [{transform_indices = @transform_0, window_bounds = array<i64: 1>}, {transform_indices = @transform_1, window_bounds = array<i64: 16, 8>}, {transform_indices = @transform_2, window_bounds = array<i64: 16, 8>}, {transform_indices = @transform_3, window_bounds = array<i64: 16, 8>}]} {
    %c0 = arith.constant 0 : index
    %c0_0 = arith.constant 0 : index
    %0 = vector.load %arg2[%c0, %c0_0] : memref<16x8xf32, #tpu.memory_space<vmem>>, vector<16x8xf32>
    %c0_1 = arith.constant 0 : index
    %c0_2 = arith.constant 0 : index
    %1 = vector.load %arg3[%c0_1, %c0_2] : memref<16x8xf32, #tpu.memory_space<vmem>>, vector<16x8xf32>
    %2 = math.absf %0 : vector<16x8xf32>
    %cst = arith.constant 0.000000e+00 : f32
    %3 = vector.broadcast %cst : f32 to vector<16x8xf32>
    %4 = arith.subf %3, %2 : vector<16x8xf32>
    %5 = math.exp %4 : vector<16x8xf32>
    %cst_3 = arith.constant 1.000000e+00 : f32
    %6 = vector.broadcast %cst_3 : f32 to vector<16x8xf32>
    %7 = arith.addf %6, %5 : vector<16x8xf32>
    %8 = tpu.reciprocal %7 {approx = true} : vector<16x8xf32> -> vector<16x8xf32>
    %9 = arith.mulf %7, %8 : vector<16x8xf32>
    %cst_4 = arith.constant 2.000000e+00 : f32
    %10 = vector.broadcast %cst_4 : f32 to vector<16x8xf32>
    %11 = arith.subf %10, %9 : vector<16x8xf32>
    %12 = arith.mulf %8, %11 : vector<16x8xf32>
    %cst_5 = arith.constant 0.000000e+00 : f32
    %13 = vector.broadcast %cst_5 : f32 to vector<16x8xf32>
    %14 = arith.cmpf oge, %0, %13 : vector<16x8xf32>
    %15 = arith.mulf %5, %12 : vector<16x8xf32>
    %16 = arith.select %14, %12, %15 : vector<16x8xi1>, vector<16x8xf32>
    %17 = arith.subf %16, %1 : vector<16x8xf32>
    %cst_6 = arith.constant 0.000000e+00 : f32
    %18 = vector.broadcast %cst_6 : f32 to vector<16x8xf32>
    %19 = arith.maximumf %0, %18 : vector<16x8xf32>
    %20 = arith.mulf %0, %1 : vector<16x8xf32>
    %21 = arith.subf %19, %20 : vector<16x8xf32>
    %22 = math.log %7 : vector<16x8xf32>
    %23 = arith.addf %21, %22 : vector<16x8xf32>
    %24 = arith.mulf %17, %17 : vector<16x8xf32>
    %c0_7 = arith.constant 0 : index
    %25 = memref.load %arg1[%c0_7] : memref<1xf32, #tpu.memory_space<smem>>
    %26 = arith.mulf %23, %24 : vector<16x8xf32>
    %27 = vector.broadcast %25 : f32 to vector<16x8xf32>
    %28 = arith.mulf %26, %27 : vector<16x8xf32>
    %c0_8 = arith.constant 0 : index
    %c0_9 = arith.constant 0 : index
    %29 = vector.load %arg4[%c0_8, %c0_9] : memref<16x8xf32, #tpu.memory_space<vmem>>, vector<16x8xf32>
    tpu.vector_store %arg4[%c0_8, %c0_9], %28 {strides = array<i32>} : memref<16x8xf32, #tpu.memory_space<vmem>>, vector<16x8xf32>,
    return
  }
  func.func @transform_0(%arg0: i32) -> i32 {
    %c0_i32 = arith.constant 0 : i32
    %c0_i32_0 = arith.constant 0 : i32
    return %c0_i32 : i32
  }
  func.func @transform_1(%arg0: i32) -> (i32, i32) {
    %c0_i32 = arith.constant 0 : i32
    %c0_i32_0 = arith.constant 0 : i32
    return %arg0, %c0_i32 : i32, i32
  }
  func.func @transform_2(%arg0: i32) -> (i32, i32) {
    %c0_i32 = arith.constant 0 : i32
    %c0_i32_0 = arith.constant 0 : i32
    return %arg0, %c0_i32 : i32, i32
  }
  func.func @transform_3(%arg0: i32) -> (i32, i32) {
    %c0_i32 = arith.constant 0 : i32
    %c0_i32_0 = arith.constant 0 : i32
    return %arg0, %c0_i32 : i32, i32
  }
}

</mosaic_0001>

<bundles_post_ra>
// kernel: tpu_custom_call.1
= control target key start
LH: loop header
LB: loop body
LE: loop exit
PB: predicated region body
PF: predicated region fallthrough
CT: control target
= control target key end

     0   :  { %s382_s14 = smov 0   ;;  %s407_s0 = inlined_call_operand.<no memory space> [shape: f32[1], index: 0, kind: input, shape index: {}]   ;;  %s408_s1 = inlined_call_operand.vmem [shape: f32[32,8], index: 1, kind: input, shape index: {}]   ;;  %s409_s2 = inlined_call_operand.vmem [shape: f32[32,8], index: 2, kind: input, shape index: {}]   ;;  %s410_s3 = inlined_call_operand.vmem [shape: f32[32,8], index: 3, kind: output, shape index: {}]  }
   0x1   :  { %8 = sst [smem:[#allocation2]] %s407_s0 }
   0x2 LB: > { %s318_s15 = sadd.s32 4294967295, %s357_s14   ;;  %p322_p0 = scmp.ge.s32.totalorder %s357_s14, 1  ;;  %s357_s14 = sphi %s382_s14, %s14_s14  }
   0x3   : > { %p150_p1 = scmp.lt.s32.totalorder %s357_s14, 3 }
   0x5   : > { %p151_p2 = pnand %p322_p0, %p150_p1 }
   0x6   : > { %s323_s16 = sshll.u32 (!%p151_p2), %s318_s15, 1  ;;  %s241_s23 = sld [smem:[#allocation2]] (!%p151_p2)  ;;  %vm247_vm2 = vcmask (!%p151_p2), 64512  }
   0x7   : > { %154 = sbr.rel (%p151_p2) target bundleno = 67 (0x43), region = 32  ;;  %p180_p3 = scmp.lt.s32.totalorder (!%p151_p2), %s323_s16, 3 }
   0xc   : > { %v244_v42 = vstv (!%p151_p2), %s241_s23 }
   0xe   : > { %s412_s16 = smov (!%p180_p3, %s323_s16), 3 }
   0xf   : > { %s390_s17 = sshll.u32 %s412_s16, 3 }
  0x10   : > { %s183_s19 = scalar_lea.vmem %s408_s1, %s390_s17  ;;  %s189_s22 = scalar_lea.vmem %s409_s2, %s390_s17 }
  0x11   : > { %v197_v0 = vld [vmem:[%s183_s19] sm:$0xff]  ;;  %v198_v1 = vld [vmem:[%s183_s19 + $0x8] sm:$0xff]  ;;  %s195_s26 = scalar_lea.vmem %s410_s3, %s390_s17 }
  0x12   : > { %v201_v2 = vand.u32 2147483647, %v197_v0  ;;  %v202_v3 = vand.u32 2147483647, %v198_v1  ;;  %v199_v12 = vld [vmem:[%s189_s22] sm:$0xff]  ;;  %v200_v14 = vld [vmem:[%s189_s22 + $0x8] sm:$0xff] }
  0x13   : > { %v227_v18 = vmax.f32 %v197_v0, 0.0  ;;  %v229_v19 = vmul.f32 %v199_v12, %v197_v0  ;;  %v228_v22 = vmax.f32 %v198_v1, 0.0  ;;  %v230_v23 = vmul.f32 %v200_v14, %v198_v1 }
  0x14   : > { %v203_v4 = vsub.f32 0.0, %v201_v2  ;;  %v204_v5 = vsub.f32 0.0, %v202_v3  ;;  %vm219_vm0 = vcmp.ge.f32.partialorder %v197_v0, 0.0  ;;  %vm220_vm1 = vcmp.ge.f32.partialorder %v198_v1, 0.0 }
  0x15   : > { %v231_v28 = vsub.f32 %v227_v18, %v229_v19  ;;  %v232_v31 = vsub.f32 %v228_v22, %v230_v23 }
  0x16   : > { %v205_v6 = vmul.f32 1.442695, %v203_v4  ;;  %v207_v7 = vmul.f32 1.442695, %v204_v5 }
  0x18   : > { %339 = vpow2.f32 %v205_v6 }
  0x19   : > { %341 = vpow2.f32 %v207_v7 }
  0x22   : > { %v340_v8 = vpop.eup %339 }
  0x23   : > { %v342_v9 = vpop.eup %341  ;;  %v209_v10 = vadd.f32 1.0, %v340_v8 }
  0x24   : > { %v210_v11 = vadd.f32 1.0, %v342_v9 }
  0x25   : > { %343 = vrcp.f32 %v209_v10 }
  0x26   : > { %345 = vrcp.f32 %v210_v11 }
  0x27   : > { %347 = vlog2.f32 %v209_v10 }
  0x28   : > { %349 = vlog2.f32 %v210_v11 }
  0x2f   : > { %v344_v13 = vpop.eup %343 }
  0x30   : > { %v346_v15 = vpop.eup %345  ;;  %v213_v16 = vmul.f32 %v344_v13, %v209_v10 }
  0x31   : > { %v214_v17 = vmul.f32 %v346_v15, %v210_v11  ;;  %v348_v20 = vpop.eup %347 }
  0x32   : > { %v215_v21 = vsub.f32 2.0, %v213_v16  ;;  %v350_v24 = vpop.eup %349  ;;  %v234_v29 = vmul.f32 0.6931472, %v348_v20 }
  0x33   : > { %v216_v25 = vsub.f32 2.0, %v214_v17  ;;  %v236_v32 = vmul.f32 0.6931472, %v350_v24 }
  0x34   : > { %v217_v26 = vmul.f32 %v344_v13, %v215_v21  ;;  %v237_v37 = vadd.f32 %v234_v29, %v231_v28 }
  0x35   : > { %v218_v27 = vmul.f32 %v346_v15, %v216_v25  ;;  %v238_v39 = vadd.f32 %v236_v32, %v232_v31 }
  0x36   : > { %v221_v30 = vmul.f32 %v340_v8, %v217_v26 }
  0x37   : > { %v222_v33 = vmul.f32 %v342_v9, %v218_v27 }
  0x38   : > { %v223_v34 = vsel %vm219_vm0, %v217_v26, %v221_v30 }
  0x39   : > { %v224_v35 = vsel %vm220_vm1, %v218_v27, %v222_v33  ;;  %v225_v36 = vsub.f32 %v223_v34, %v199_v12 }
  0x3a   : > { %v226_v38 = vsub.f32 %v224_v35, %v200_v14 }
  0x3b   : > { %v239_v40 = vmul.f32 %v225_v36, %v225_v36 }
  0x3c   : > { %v240_v41 = vmul.f32 %v226_v38, %v226_v38 }
  0x3d   : > { %v242_v43 = vmul.f32 %v239_v40, %v237_v37 }
  0x3e   : > { %v243_v44 = vmul.f32 %v240_v41, %v238_v39 }
  0x3f   : > { %v245_v45 = vmul.f32 %v244_v42, %v242_v43 }
  0x40   : > { %v246_v46 = vmul.f32 %v244_v42, %v243_v44 }
  0x41   : > { %248 = vst.msk [vmem:[%s195_s26] sm:$0xff] %vm247_vm2, %v245_v45 }
  0x42   : > { %249 = vst.msk [vmem:[%s195_s26 + $0x8] sm:$0xff] %vm247_vm2, %v246_v46 }
  0x43 PF: > { %s14_s14 = sadd.s32 1, %s357_s14  }
  0x44   : > { %p11_p4 = scmp.ge.s32.totalorder %s14_s14, 4  }
  0x46   :  { %13 = sbr.rel (!%p11_p4) target bundleno = 2 (0x2), region = 65 }

</bundles_post_ra>
